<compile_context>
chip_gen: v7x
topology: tpu7x:2x2x1
jax: 0.10.0
libtpu: 0.0.40
codegen_flags: <defaults>
</compile_context>

<pallas_src>
import functools

import jax
import jax.numpy as jnp
from jax import lax
from jax.experimental import pallas as pl
from jax.experimental.pallas import tpu as pltpu


# ----------------------------------------------------------------------------- kernel
def _decoder_fused_kernel(x_ref, c_ref, t_ref,
                          wxa_ref, ws_ref, bsc_ref, wp_ref, bps_ref,
                          *rest,
                          num_layers, seq_len, d_model, apply_norm, eps):
    """Fused Decoder forward.

    Activations are (B*L, D); weights pre-stacked over layers.
    rest = (gamma_ref, beta_ref, out_ref) if apply_norm else (out_ref,).
    Output is packed [x | trend] with lane width 2*D (=128 here).
    """
    if apply_norm:
        gamma_ref, beta_ref, out_ref = rest
    else:
        (out_ref,) = rest

    D = d_model
    x = x_ref[...].astype(jnp.float32)                         # (B*L, D)
    # Fold all per-layer trend-projection biases in once.
    trend = t_ref[...].astype(jnp.float32) + bps_ref[...]      # (B*L, D)

    # Loop-invariant cross contribution for ALL layers in one lane-dense GEMM:
    # (B*L, D) @ (D, NL*D) -> (B*L, NL*D); NL*D is a multiple of 128 for even NL.
    cross_proj = jnp.dot(c_ref[...].astype(jnp.float32), wxa_ref[...],
                         preferred_element_type=jnp.float32)

    # Hoisted row masks for per-batch edge replication of the kernel-3 moving average
    # (batch folded into rows, so replication happens at every seq_len boundary).
    # They also mask out the wrap-around rows introduced by pltpu.roll.
    row = lax.broadcasted_iota(jnp.int32, x.shape, 0)
    pos = row % seq_len
    is_first = pos == 0
    is_last = pos == seq_len - 1
    inv3 = jnp.float32(1.0 / 3.0)
    bl = x.shape[0]

    for l in range(num_layers):                 # static unroll (NL is tiny)
        # self transform (K=D GEMM) + precomputed cross slice + fused bias + residual.
        y = (x
             + jnp.dot(x, ws_ref[l], preferred_element_type=jnp.float32)
             + bsc_ref[l]                       # b_self + b_cross (pre-folded)
             + cross_proj[:, l * D:(l + 1) * D])

        # series decomposition: moving average (kernel=3) along seq, edge-replicated.
        # Sublane rotations on the XLU; edge rows fixed up by the masks.
        prev = jnp.where(is_first, y, pltpu.roll(y, shift=1, axis=0))        # y[t-1]
        nxt = jnp.where(is_last, y, pltpu.roll(y, shift=bl - 1, axis=0))     # y[t+1]
        moving_mean = (prev + y + nxt) * inv3
        x = y - moving_mean                     # seasonal part

        # residual trend projection + accumulation (biases already folded above).
        trend = trend + jnp.dot(moving_mean, wp_ref[l],
                                preferred_element_type=jnp.float32)

    if apply_norm:
        mean = jnp.mean(x, axis=-1, keepdims=True)
        xcen = x - mean
        var = jnp.mean(xcen * xcen, axis=-1, keepdims=True)
        x = xcen * lax.rsqrt(var + eps) * gamma_ref[...] + beta_ref[...]

    # Single lane-dense (2*D = 128 wide) unmasked store of [x | trend].
    out_ref[...] = jnp.concatenate([x, trend], axis=-1).astype(out_ref.dtype)


# ------------------------------------------------------------------- one-time packing
def pack_decoder_params(params):
    """One-time weight packing (outside the per-call path): stack per-layer weights,
    fuse self/cross biases, fold trend-projection biases, stack cross weights along
    the lane axis for the loop-invariant pre-GEMM."""
    layers = params["layers"]
    nl = len(layers)
    d = layers[0]["w_self"].shape[0]

    packed = dict(
        num_layers=nl,
        d_model=d,
        # (D, NL*D): all layers' cross projections computed by one lane-dense GEMM.
        w_cross_all=jnp.concatenate([p["w_cross"] for p in layers],
                                    axis=1).astype(jnp.float32),
        w_self=jnp.stack([p["w_self"] for p in layers]).astype(jnp.float32),   # (NL,D,D)
        b_sc=jnp.stack([(p["b_self"] + p["b_cross"])[None, :]
                        for p in layers]).astype(jnp.float32),                  # (NL,1,D)
        w_proj=jnp.stack([p["w_proj"] for p in layers]).astype(jnp.float32),    # (NL,D,D)
        b_proj_sum=functools.reduce(
            lambda a, b: a + b,
            [p["b_proj"] for p in layers])[None, :].astype(jnp.float32),        # (1,D)
    )

    norm = params.get("norm")
    if norm is not None:
        packed["gamma"] = norm["gamma"][None, :].astype(jnp.float32)
        packed["beta"] = norm["beta"][None, :].astype(jnp.float32)
    else:
        packed["gamma"] = None
        packed["beta"] = None
    return packed


# ----------------------------------------------------------------------------- wrapper
def decoder_forward(X, cross, trend, packed, eps=1e-5):
    """Decoder.forward(X, cross, trend) -> (X, trend) — single fused pallas_call."""
    B, L, D = X.shape
    nl = packed["num_layers"]
    apply_norm = packed["gamma"] is not None

    # Fold batch into the matmul M dimension: (B, L, D) -> (B*L, D) (free reshape).
    x2 = X.reshape(B * L, D)
    c2 = cross.reshape(B * L, D)
    t2 = trend.reshape(B * L, D)

    args = [x2, c2, t2,
            packed["w_cross_all"], packed["w_self"], packed["b_sc"],
            packed["w_proj"], packed["b_proj_sum"]]
    if apply_norm:
        args += [packed["gamma"], packed["beta"]]

    kernel = functools.partial(_decoder_fused_kernel,
                               num_layers=nl, seq_len=L, d_model=D,
                               apply_norm=apply_norm, eps=eps)
    vspec = pl.BlockSpec(memory_space=pltpu.MemorySpace.VMEM)

    out = pl.pallas_call(
        kernel,
        out_shape=jax.ShapeDtypeStruct((B * L, 2 * D), X.dtype),
        in_specs=[vspec] * len(args),
        out_specs=vspec,
    )(*args)

    x_out = out[:, :D].reshape(B, L, D)
    t_out = out[:, D:].reshape(B, L, D)
    return x_out, t_out


# ----------------------------------------------------------------------------- reference
def _reference_forward(X, cross, trend, params):
    for p in params["layers"]:
        y = X + X @ p["w_self"] + p["b_self"] + cross @ p["w_cross"] + p["b_cross"]
        prev = jnp.concatenate([y[:, :1], y[:, :-1]], axis=1)
        nxt = jnp.concatenate([y[:, 1:], y[:, -1:]], axis=1)
        ma = (prev + y + nxt) / 3.0
        X = y - ma
        trend = trend + (ma @ p["w_proj"] + p["b_proj"])
    if params.get("norm") is not None:
        g, b = params["norm"]["gamma"], params["norm"]["beta"]
        mean = X.mean(-1, keepdims=True)
        var = ((X - mean) ** 2).mean(-1, keepdims=True)
        X = (X - mean) / jnp.sqrt(var + 1e-5) * g + b
    return X, trend


# ----------------------------------------------------------------------------- params
def init_params(key, d_model, num_layers):
    layers = []
    for i in range(num_layers):
        k = jax.random.fold_in(key, i)
        ks = jax.random.split(k, 6)
        scale = 0.1
        layers.append(dict(
            w_self=scale * jax.random.normal(ks[0], (d_model, d_model), jnp.float32),
            b_self=scale * jax.random.normal(ks[1], (d_model,), jnp.float32),
            w_cross=scale * jax.random.normal(ks[2], (d_model, d_model), jnp.float32),
            b_cross=scale * jax.random.normal(ks[3], (d_model,), jnp.float32),
            w_proj=scale * jax.random.normal(ks[4], (d_model, d_model), jnp.float32),
            b_proj=scale * jax.random.normal(ks[5], (d_model,), jnp.float32),
        ))
    k_lin = jax.random.fold_in(key, 1000)
    return dict(
        layers=layers,
        norm=dict(gamma=jnp.ones((d_model,), jnp.float32),
                  beta=jnp.zeros((d_model,), jnp.float32)),
        # nn.Linear(2*64, 64) from Decoder.__init__ — defined but unused in forward().
        linear_w=0.1 * jax.random.normal(k_lin, (2 * 64, 64), jnp.float32),
        linear_b=jnp.zeros((64,), jnp.float32),
    )


# ----------------------------------------------------------------------------- main
if __name__ == "__main__":
    B, L, D = 2, 8, 64          # batch, seq_len, d_model (d_model=64 implied by Linear(2*64, 64))
    NUM_LAYERS = 2

    key = jax.random.PRNGKey(0)
    kx, kc, kt, kp = jax.random.split(key, 4)
    X = jax.random.normal(kx, (B, L, D), jnp.float32)
    cross = jax.random.normal(kc, (B, L, D), jnp.float32)
    trend = jax.random.normal(kt, (B, L, D), jnp.float32)
    params = init_params(kp, D, NUM_LAYERS)

    packed = pack_decoder_params(params)            # one-time weight packing

    X_out, trend_out = decoder_forward(X, cross, trend, packed)
    X_out = jax.block_until_ready(X_out)
    trend_out = jax.block_until_ready(trend_out)

    X_ref, trend_ref = _reference_forward(X, cross, trend, params)
    assert jnp.allclose(X_out, X_ref, atol=1e-4, rtol=1e-4)
    assert jnp.allclose(trend_out, trend_ref, atol=1e-4, rtol=1e-4)

    print("KERNEL_OK")
</pallas_src>

<mosaic_0001>
module attributes {stable_mosaic.version = 11 : i64} {
  func.func @_decoder_fused_kernel(%arg0: memref<16x64xf32, #tpu.memory_space<vmem>>, %arg1: memref<16x64xf32, #tpu.memory_space<vmem>>, %arg2: memref<16x64xf32, #tpu.memory_space<vmem>>, %arg3: memref<64x128xf32, #tpu.memory_space<vmem>>, %arg4: memref<2x64x64xf32, #tpu.memory_space<vmem>>, %arg5: memref<2x1x64xf32, #tpu.memory_space<vmem>>, %arg6: memref<2x64x64xf32, #tpu.memory_space<vmem>>, %arg7: memref<1x64xf32, #tpu.memory_space<vmem>>, %arg8: memref<1x64xf32, #tpu.memory_space<vmem>>, %arg9: memref<1x64xf32, #tpu.memory_space<vmem>>, %arg10: memref<16x128xf32, #tpu.memory_space<vmem>>) attributes {dimension_semantics = [], scalar_prefetch = 0 : i64, scratch_operands = 0 : i64, tpu.core_type = #tpu.core_type<tc>} {
    %c0 = arith.constant 0 : index
    %c0_0 = arith.constant 0 : index
    %0 = vector.load %arg0[%c0, %c0_0] : memref<16x64xf32, #tpu.memory_space<vmem>>, vector<16x64xf32>
    %c0_1 = arith.constant 0 : index
    %c0_2 = arith.constant 0 : index
    %1 = vector.load %arg2[%c0_1, %c0_2] : memref<16x64xf32, #tpu.memory_space<vmem>>, vector<16x64xf32>
    %c0_3 = arith.constant 0 : index
    %c0_4 = arith.constant 0 : index
    %2 = vector.load %arg7[%c0_3, %c0_4] : memref<1x64xf32, #tpu.memory_space<vmem>>, vector<1x64xf32>
    %3 = vector.broadcast %2 : vector<1x64xf32> to vector<16x64xf32>
    %4 = arith.addf %1, %3 : vector<16x64xf32>
    %c0_5 = arith.constant 0 : index
    %c0_6 = arith.constant 0 : index
    %5 = vector.load %arg1[%c0_5, %c0_6] : memref<16x64xf32, #tpu.memory_space<vmem>>, vector<16x64xf32>
    %c0_7 = arith.constant 0 : index
    %c0_8 = arith.constant 0 : index
    %6 = vector.load %arg3[%c0_7, %c0_8] : memref<64x128xf32, #tpu.memory_space<vmem>>, vector<64x128xf32>
    %cst = arith.constant dense<0.000000e+00> : vector<16x128xf32>
    %7 = tpu.matmul %5, %6, %cst {dimension_numbers = #tpu.dot_dimension_numbers<[1], [0], [0], [1], [0, 0, 1, 1], [], []>} : vector<16x64xf32>, vector<64x128xf32>, vector<16x128xf32> -> vector<16x128xf32>
    %8 = tpu.iota {dimensions = array<i32: 0>} : vector<16x64xi32>
    %c8_i32 = arith.constant 8 : i32
    %c0_i32 = arith.constant 0 : i32
    %9 = arith.cmpi eq, %c8_i32, %c0_i32 : i32
    %c1_i32 = arith.constant 1 : i32
    %10 = arith.select %9, %c1_i32, %c8_i32 : i32
    %11 = vector.broadcast %10 : i32 to vector<16x64xi32>
    %12 = arith.remsi %8, %11 : vector<16x64xi32>
    %c0_i32_9 = arith.constant 0 : i32
    %13 = vector.broadcast %c0_i32_9 : i32 to vector<16x64xi32>
    %14 = arith.cmpi ne, %12, %13 : vector<16x64xi32>
    %c0_i32_10 = arith.constant 0 : i32
    %15 = vector.broadcast %c0_i32_10 : i32 to vector<16x64xi32>
    %16 = arith.cmpi slt, %12, %15 : vector<16x64xi32>
    %c0_i32_11 = arith.constant 0 : i32
    %17 = arith.cmpi slt, %10, %c0_i32_11 : i32
    %18 = vector.broadcast %17 : i1 to vector<16x64xi1>
    %19 = vector.broadcast %18 : vector<16x64xi1> to vector<16x64xi1>
    %20 = arith.xori %16, %19 : vector<16x64xi1>
    %21 = arith.andi %20, %14 : vector<16x64xi1>
    %22 = vector.broadcast %10 : i32 to vector<16x64xi32>
    %23 = arith.addi %12, %22 : vector<16x64xi32>
    %24 = arith.select %21, %23, %12 : vector<16x64xi1>, vector<16x64xi32>
    %c0_i32_12 = arith.constant 0 : i32
    %25 = vector.broadcast %c0_i32_12 : i32 to vector<16x64xi32>
    %26 = arith.cmpi eq, %24, %25 : vector<16x64xi32>
    %c7_i32 = arith.constant 7 : i32
    %27 = vector.broadcast %c7_i32 : i32 to vector<16x64xi32>
    %28 = arith.cmpi eq, %24, %27 : vector<16x64xi32>
    %c0_13 = arith.constant 0 : index
    %c0_14 = arith.constant 0 : index
    %c0_15 = arith.constant 0 : index
    %29 = vector.load %arg4[%c0_13, %c0_14, %c0_15] : memref<2x64x64xf32, #tpu.memory_space<vmem>>, vector<1x64x64xf32>
    %30 = vector.shape_cast %29 : vector<1x64x64xf32> to vector<64x64xf32>
    %cst_16 = arith.constant dense<0.000000e+00> : vector<16x64xf32>
    %31 = tpu.matmul %0, %30, %cst_16 {dimension_numbers = #tpu.dot_dimension_numbers<[1], [0], [0], [1], [0, 0, 1, 1], [], []>} : vector<16x64xf32>, vector<64x64xf32>, vector<16x64xf32> -> vector<16x64xf32>
    %32 = arith.addf %0, %31 : vector<16x64xf32>
    %c0_17 = arith.constant 0 : index
    %c0_18 = arith.constant 0 : index
    %c0_19 = arith.constant 0 : index
    %33 = vector.load %arg5[%c0_17, %c0_18, %c0_19] : memref<2x1x64xf32, #tpu.memory_space<vmem>>, vector<1x1x64xf32>
    %34 = vector.shape_cast %33 : vector<1x1x64xf32> to vector<1x64xf32>
    %35 = vector.broadcast %34 : vector<1x64xf32> to vector<16x64xf32>
    %36 = arith.addf %32, %35 : vector<16x64xf32>
    %37 = vector.extract_strided_slice %7 {offsets = [0, 0], sizes = [16, 64], strides = [1, 1]} : vector<16x128xf32> to vector<16x64xf32>
    %38 = arith.addf %36, %37 : vector<16x64xf32>
    %c1_i32_20 = arith.constant 1 : i32
    %39 = tpu.dynamic_rotate %38 by %c1_i32_20 dim 0 : vector<16x64xf32>, i32 -> vector<16x64xf32>
    %40 = arith.select %26, %38, %39 : vector<16x64xi1>, vector<16x64xf32>
    %c15_i32 = arith.constant 15 : i32
    %41 = tpu.dynamic_rotate %38 by %c15_i32 dim 0 : vector<16x64xf32>, i32 -> vector<16x64xf32>
    %42 = arith.select %28, %38, %41 : vector<16x64xi1>, vector<16x64xf32>
    %43 = arith.addf %40, %38 : vector<16x64xf32>
    %44 = arith.addf %43, %42 : vector<16x64xf32>
    %cst_21 = arith.constant 0.333333343 : f32
    %45 = vector.broadcast %cst_21 : f32 to vector<16x64xf32>
    %46 = arith.mulf %44, %45 : vector<16x64xf32>
    %47 = arith.subf %38, %46 : vector<16x64xf32>
    %c0_22 = arith.constant 0 : index
    %c0_23 = arith.constant 0 : index
    %c0_24 = arith.constant 0 : index
    %48 = vector.load %arg6[%c0_22, %c0_23, %c0_24] : memref<2x64x64xf32, #tpu.memory_space<vmem>>, vector<1x64x64xf32>
    %49 = vector.shape_cast %48 : vector<1x64x64xf32> to vector<64x64xf32>
    %cst_25 = arith.constant dense<0.000000e+00> : vector<16x64xf32>
    %50 = tpu.matmul %46, %49, %cst_25 {dimension_numbers = #tpu.dot_dimension_numbers<[1], [0], [0], [1], [0, 0, 1, 1], [], []>} : vector<16x64xf32>, vector<64x64xf32>, vector<16x64xf32> -> vector<16x64xf32>
    %51 = arith.addf %4, %50 : vector<16x64xf32>
    %c1 = arith.constant 1 : index
    %c0_26 = arith.constant 0 : index
    %c0_27 = arith.constant 0 : index
    %52 = vector.load %arg4[%c1, %c0_26, %c0_27] : memref<2x64x64xf32, #tpu.memory_space<vmem>>, vector<1x64x64xf32>
    %53 = vector.shape_cast %52 : vector<1x64x64xf32> to vector<64x64xf32>
    %cst_28 = arith.constant dense<0.000000e+00> : vector<16x64xf32>
    %54 = tpu.matmul %47, %53, %cst_28 {dimension_numbers = #tpu.dot_dimension_numbers<[1], [0], [0], [1], [0, 0, 1, 1], [], []>} : vector<16x64xf32>, vector<64x64xf32>, vector<16x64xf32> -> vector<16x64xf32>
    %55 = arith.addf %47, %54 : vector<16x64xf32>
    %c1_29 = arith.constant 1 : index
    %c0_30 = arith.constant 0 : index
    %c0_31 = arith.constant 0 : index
    %56 = vector.load %arg5[%c1_29, %c0_30, %c0_31] : memref<2x1x64xf32, #tpu.memory_space<vmem>>, vector<1x1x64xf32>
    %57 = vector.shape_cast %56 : vector<1x1x64xf32> to vector<1x64xf32>
    %58 = vector.broadcast %57 : vector<1x64xf32> to vector<16x64xf32>
    %59 = arith.addf %55, %58 : vector<16x64xf32>
    %60 = vector.extract_strided_slice %7 {offsets = [0, 64], sizes = [16, 64], strides = [1, 1]} : vector<16x128xf32> to vector<16x64xf32>
    %61 = arith.addf %59, %60 : vector<16x64xf32>
    %c1_i32_32 = arith.constant 1 : i32
    %62 = tpu.dynamic_rotate %61 by %c1_i32_32 dim 0 : vector<16x64xf32>, i32 -> vector<16x64xf32>
    %63 = arith.select %26, %61, %62 : vector<16x64xi1>, vector<16x64xf32>
    %c15_i32_33 = arith.constant 15 : i32
    %64 = tpu.dynamic_rotate %61 by %c15_i32_33 dim 0 : vector<16x64xf32>, i32 -> vector<16x64xf32>
    %65 = arith.select %28, %61, %64 : vector<16x64xi1>, vector<16x64xf32>
    %66 = arith.addf %63, %61 : vector<16x64xf32>
    %67 = arith.addf %66, %65 : vector<16x64xf32>
    %cst_34 = arith.constant 0.333333343 : f32
    %68 = vector.broadcast %cst_34 : f32 to vector<16x64xf32>
    %69 = arith.mulf %67, %68 : vector<16x64xf32>
    %70 = arith.subf %61, %69 : vector<16x64xf32>
    %c1_35 = arith.constant 1 : index
    %c0_36 = arith.constant 0 : index
    %c0_37 = arith.constant 0 : index
    %71 = vector.load %arg6[%c1_35, %c0_36, %c0_37] : memref<2x64x64xf32, #tpu.memory_space<vmem>>, vector<1x64x64xf32>
    %72 = vector.shape_cast %71 : vector<1x64x64xf32> to vector<64x64xf32>
    %cst_38 = arith.constant dense<0.000000e+00> : vector<16x64xf32>
    %73 = tpu.matmul %69, %72, %cst_38 {dimension_numbers = #tpu.dot_dimension_numbers<[1], [0], [0], [1], [0, 0, 1, 1], [], []>} : vector<16x64xf32>, vector<64x64xf32>, vector<16x64xf32> -> vector<16x64xf32>
    %74 = arith.addf %51, %73 : vector<16x64xf32>
    %cst_39 = arith.constant dense<0.000000e+00> : vector<16xf32>
    %75 = vector.multi_reduction <add>, %70, %cst_39 [1] : vector<16x64xf32> to vector<16xf32>
    %76 = vector.shape_cast %75 : vector<16xf32> to vector<16x1xf32>
    %cst_40 = arith.constant 6.400000e+01 : f32
    %77 = vector.broadcast %cst_40 : f32 to vector<16x1xf32>
    %78 = arith.divf %76, %77 : vector<16x1xf32>
    %79 = vector.broadcast %78 : vector<16x1xf32> to vector<16x64xf32>
    %80 = arith.subf %70, %79 : vector<16x64xf32>
    %81 = arith.mulf %80, %80 : vector<16x64xf32>
    %cst_41 = arith.constant dense<0.000000e+00> : vector<16xf32>
    %82 = vector.multi_reduction <add>, %81, %cst_41 [1] : vector<16x64xf32> to vector<16xf32>
    %83 = vector.shape_cast %82 : vector<16xf32> to vector<16x1xf32>
    %cst_42 = arith.constant 6.400000e+01 : f32
    %84 = vector.broadcast %cst_42 : f32 to vector<16x1xf32>
    %85 = arith.divf %83, %84 : vector<16x1xf32>
    %cst_43 = arith.constant 9.99999974E-6 : f32
    %86 = vector.broadcast %cst_43 : f32 to vector<16x1xf32>
    %87 = arith.addf %85, %86 : vector<16x1xf32>
    %88 = math.rsqrt %87 : vector<16x1xf32>
    %89 = vector.broadcast %88 : vector<16x1xf32> to vector<16x64xf32>
    %90 = arith.mulf %80, %89 : vector<16x64xf32>
    %c0_44 = arith.constant 0 : index
    %c0_45 = arith.constant 0 : index
    %91 = vector.load %arg8[%c0_44, %c0_45] : memref<1x64xf32, #tpu.memory_space<vmem>>, vector<1x64xf32>
    %92 = vector.broadcast %91 : vector<1x64xf32> to vector<16x64xf32>
    %93 = arith.mulf %90, %92 : vector<16x64xf32>
    %c0_46 = arith.constant 0 : index
    %c0_47 = arith.constant 0 : index
    %94 = vector.load %arg9[%c0_46, %c0_47] : memref<1x64xf32, #tpu.memory_space<vmem>>, vector<1x64xf32>
    %95 = vector.broadcast %94 : vector<1x64xf32> to vector<16x64xf32>
    %96 = arith.addf %93, %95 : vector<16x64xf32>
    %97 = tpu.concatenate %96, %74 in 1 : vector<16x64xf32>, vector<16x64xf32> -> vector<16x128xf32>
    %c0_48 = arith.constant 0 : index
    %c0_49 = arith.constant 0 : index
    %98 = vector.load %arg10[%c0_48, %c0_49] : memref<16x128xf32, #tpu.memory_space<vmem>>, vector<16x128xf32>
    tpu.vector_store %arg10[%c0_48, %c0_49], %97 {strides = array<i32>} : memref<16x128xf32, #tpu.memory_space<vmem>>, vector<16x128xf32>,
    return
  }
}

</mosaic_0001>

<bundles_post_ra>
// kernel: tpu_custom_call.1
= control target key start
LH: loop header
LB: loop body
LE: loop exit
PB: predicated region body
PF: predicated region fallthrough
CT: control target
= control target key end

     0   :  { %15 = vsyncpa [#allocation3], 0  ;;  %s1477_s0 = inlined_call_operand.hbm [shape: f32[16,64], index: 0, kind: input, shape index: {}]   ;;  %s1478_s1 = inlined_call_operand.hbm [shape: f32[16,64], index: 1, kind: input, shape index: {}]   ;;  %s1479_s2 = inlined_call_operand.hbm [shape: f32[16,64], index: 2, kind: input, shape index: {}]   ;;  %s1480_s3 = inlined_call_operand.hbm [shape: f32[64,128], index: 3, kind: input, shape index: {}]   ;;  %s1481_s4 = inlined_call_operand.hbm [shape: f32[2,64,64], index: 4, kind: input, shape index: {}]   ;;  %s1482_s5 = inlined_call_operand.vmem [shape: f32[2,1,64], index: 5, kind: input, shape index: {}]   ;;  %s1483_s6 = inlined_call_operand.hbm [shape: f32[2,64,64], index: 6, kind: input, shape index: {}]   ;;  %s1484_s7 = inlined_call_operand.vmem [shape: f32[1,64], index: 7, kind: input, shape index: {}]   ;;  %s1485_s8 = inlined_call_operand.vmem [shape: f32[1,64], index: 8, kind: input, shape index: {}]   ;;  %s1486_s9 = inlined_call_operand.vmem [shape: f32[1,64], index: 9, kind: input, shape index: {}]   ;;  %s1487_s10 = inlined_call_operand.hbm [shape: f32[16,128], index: 10, kind: output, shape index: {}]  }
   0x1   :  { %16 = vsyncpa [#allocation6], 0 }
   0x2   :  { %17 = vsyncpa [#allocation9], 0 }
   0x3   :  { %18 = vsyncpa [#allocation12], 0 }
   0x4   :  { %19 = vsyncpa [#allocation4], 0  ;;  %s1193_s13 = smov [#allocation5]   ;;  %s1194_s15 = smov [#allocation8]  }
   0x5   :  { %s37_s14 = sshll.u32 %s1193_s13, 4  ;;  %s61_s16 = sshll.u32 %s1194_s15, 4  ;;  %s38_s14 = int_to_ptr.vmem [resolvable:$true] %s37_s14  ;;  %s1258_s16 = int_to_ptr.vmem [resolvable:$true] %s61_s16 }
   0x6   :  { %s1029_s19 = scalar_lea.hbm %s1478_s1, 256 }
   0x7   :  { %p1030_p0 = scmp.ne.s32.totalorder %s1478_s1, %s1029_s19  ;;  %p1033_p1 = scmp.lt.u32.totalorder %s1029_s19, %s1478_s1 }
   0x9   :  { %p1035_p2 = pnand %p1033_p1, %p1030_p0 }
   0xb   :  { %1038 = shalt.err (!%p1035_p2)
}
   0xc   :  { %s1039_s24 = scalar_lea.vmem %s38_s14, 256  ;;  %p1044_p4 = scmp.lt.s32.totalorder %s38_s14, %s38_s14 }
   0xd   :  { %p1040_p3 = scmp.ne.s32.totalorder %s38_s14, %s1039_s24  ;;  %p1045_p5 = scmp.lt.s32.totalorder %s1039_s24, %s1039_s24 }
   0xf   :  { %p1046_p6 = por %p1045_p5, %p1044_p4 }
  0x11   :  { %p1047_p7 = pnand %p1046_p6, %p1040_p3 }
  0x13   :  { %1050 = shalt.err (!%p1047_p7)
}
  0x14   :  { %s1195_s25 = smov 128   ;;  %s1196_s26 = smov 8  }
  0x15   :  { %43 = dma.hbm_to_vmem [thread:$0]  %s1478_s1, 256, %s38_s14, [#allocation6], %s1195_s25, %s1195_s25, %s1196_s26  }
  0x16   :  { %s1051_s11 = scalar_lea.hbm %s1480_s3, 1024 }
  0x17   :  { %p1052_p8 = scmp.ne.s32.totalorder %s1480_s3, %s1051_s11  ;;  %p1055_p9 = scmp.lt.u32.totalorder %s1051_s11, %s1480_s3 }
  0x19   :  { %p1057_p10 = pnand %p1055_p9, %p1052_p8 }
  0x1b   :  { %1060 = shalt.err (!%p1057_p10)
}
  0x1c   :  { %s1061_s18 = scalar_lea.vmem %s1258_s16, 1024  ;;  %p1066_p12 = scmp.lt.s32.totalorder %s1258_s16, %s1258_s16 }
  0x1d   :  { %p1062_p11 = scmp.ne.s32.totalorder %s1258_s16, %s1061_s18  ;;  %p1067_p13 = scmp.lt.s32.totalorder %s1061_s18, %s1061_s18 }
  0x1f   :  { %p1068_p0 = por %p1067_p13, %p1066_p12 }
  0x21   :  { %p1069_p1 = pnand %p1068_p0, %p1062_p11 }
  0x23   :  { %1072 = shalt.err (!%p1069_p1)
}
  0x24   :  { %67 = dma.hbm_to_vmem [thread:$0]  %s1480_s3, 1024, %s1258_s16, [#allocation9], %s1195_s25, %s1195_s25, %s1196_s26  }
  0x25   :  { %s1197_s19 = smov [#allocation2]   ;;  %s1198_s21 = smov [#allocation7]  }
  0x26   :  { %s25_s20 = sshll.u32 %s1197_s19, 4  ;;  %s49_s22 = sshll.u32 %s1198_s21, 4  ;;  %s26_s20 = int_to_ptr.vmem [resolvable:$true] %s25_s20  ;;  %s1295_s22 = int_to_ptr.vmem [resolvable:$true] %s49_s22 }
  0x27   :  { %s1073_s27 = scalar_lea.hbm %s1477_s0, 256 }
  0x28   :  { %p1074_p2 = scmp.ne.s32.totalorder %s1477_s0, %s1073_s27  ;;  %p1077_p3 = scmp.lt.u32.totalorder %s1073_s27, %s1477_s0 }
  0x2a   :  { %p1079_p4 = pnand %p1077_p3, %p1074_p2 }
  0x2c   :  { %1082 = shalt.err (!%p1079_p4)
}
  0x2d   :  { %s1083_s3 = scalar_lea.vmem %s26_s20, 256  ;;  %p1088_p6 = scmp.lt.s32.totalorder %s26_s20, %s26_s20 }
  0x2e   :  { %p1084_p5 = scmp.ne.s32.totalorder %s26_s20, %s1083_s3  ;;  %p1089_p7 = scmp.lt.s32.totalorder %s1083_s3, %s1083_s3 }
  0x30   :  { %p1090_p8 = por %p1089_p7, %p1088_p6 }
  0x32   :  { %p1091_p9 = pnand %p1090_p8, %p1084_p5 }
  0x34   :  { %1094 = shalt.err (!%p1091_p9)
}
  0x35   :  { %31 = dma.hbm_to_vmem [thread:$0]  %s1477_s0, 256, %s26_s20, [#allocation3], %s1195_s25, %s1195_s25, %s1196_s26  }
  0x36   :  { %s1095_s17 = scalar_lea.hbm %s1479_s2, 256 }
  0x37   :  { %p1096_p10 = scmp.ne.s32.totalorder %s1479_s2, %s1095_s17  ;;  %p1099_p11 = scmp.lt.u32.totalorder %s1095_s17, %s1479_s2 }
  0x39   :  { %p1101_p12 = pnand %p1099_p11, %p1096_p10 }
  0x3b   :  { %1104 = shalt.err (!%p1101_p12)
}
  0x3c   :  { %s1105_s21 = scalar_lea.vmem %s1295_s22, 256  ;;  %p1110_p0 = scmp.lt.s32.totalorder %s1295_s22, %s1295_s22 }
  0x3d   :  { %p1106_p13 = scmp.ne.s32.totalorder %s1295_s22, %s1105_s21  ;;  %p1111_p1 = scmp.lt.s32.totalorder %s1105_s21, %s1105_s21 }
  0x3f   :  { %p1112_p2 = por %p1111_p1, %p1110_p0 }
  0x41   :  { %p1113_p3 = pnand %p1112_p2, %p1106_p13 }
  0x43   :  { %1116 = shalt.err (!%p1113_p3)
}
  0x44   :  { %55 = dma.hbm_to_vmem [thread:$0]  %s1479_s2, 256, %s1295_s22, [#allocation6], %s1195_s25, %s1195_s25, %s1196_s26  }
  0x45   :  { %s1199_s23 = smov [#allocation10]   ;;  %s1200_s27 = smov [#allocation11]  }
  0x46   :  { %s73_s24 = sshll.u32 %s1199_s23, 4  ;;  %s87_s28 = sshll.u32 %s1200_s27, 4  ;;  %s74_s24 = int_to_ptr.vmem [resolvable:$true] %s73_s24  ;;  %s1332_s28 = int_to_ptr.vmem [resolvable:$true] %s87_s28 }
  0x47   :  { %s1117_s11 = scalar_lea.hbm %s1481_s4, 2048 }
  0x48   :  { %p1118_p4 = scmp.ne.s32.totalorder %s1481_s4, %s1117_s11  ;;  %p1121_p5 = scmp.lt.u32.totalorder %s1117_s11, %s1481_s4 }
  0x4a   :  { %p1123_p6 = pnand %p1121_p5, %p1118_p4 }
  0x4c   :  { %1126 = shalt.err (!%p1123_p6)
}
  0x4d   :  { %s1127_s2 = scalar_lea.vmem %s74_s24, 2048  ;;  %p1132_p8 = scmp.lt.s32.totalorder %s74_s24, %s74_s24 }
  0x4e   :  { %p1128_p7 = scmp.ne.s32.totalorder %s74_s24, %s1127_s2  ;;  %p1133_p9 = scmp.lt.s32.totalorder %s1127_s2, %s1127_s2 }
  0x50   :  { %p1134_p10 = por %p1133_p9, %p1132_p8 }
  0x52   :  { %p1135_p11 = pnand %p1134_p10, %p1128_p7 }
  0x54   :  { %1138 = shalt.err (!%p1135_p11)
}
  0x55   :  { %79 = dma.hbm_to_vmem [thread:$0]  %s1481_s4, 2048, %s74_s24, [#allocation9], %s1195_s25, %s1195_s25, %s1196_s26  }
  0x56   :  { %s1139_s1 = scalar_lea.hbm %s1483_s6, 2048 }
  0x57   :  { %p1140_p12 = scmp.ne.s32.totalorder %s1483_s6, %s1139_s1  ;;  %p1143_p13 = scmp.lt.u32.totalorder %s1139_s1, %s1483_s6 }
  0x59   :  { %p1145_p0 = pnand %p1143_p13, %p1140_p12 }
  0x5b   :  { %1148 = shalt.err (!%p1145_p0)
}
  0x5c   :  { %s1149_s20 = scalar_lea.vmem %s1332_s28, 2048  ;;  %p1154_p2 = scmp.lt.s32.totalorder %s1332_s28, %s1332_s28 }
  0x5d   :  { %p1150_p1 = scmp.ne.s32.totalorder %s1332_s28, %s1149_s20  ;;  %p1155_p3 = scmp.lt.s32.totalorder %s1149_s20, %s1149_s20 }
  0x5f   :  { %p1156_p4 = por %p1155_p3, %p1154_p2 }
  0x61   :  { %p1157_p5 = pnand %p1156_p4, %p1150_p1 }
  0x63   :  { %1160 = shalt.err (!%p1157_p5)
}
  0x64   :  { %93 = dma.hbm_to_vmem [thread:$0]  %s1483_s6, 2048, %s1332_s28, [#allocation12], %s1195_s25, %s1195_s25, %s1196_s26  }
  0x65   :  { %1183 = dma.done.wait [#allocation3], 256  }
  0x66   :  { %1184 = vsyncadd [#allocation3], 4294967040 }
  0x67   :  { %1185 = dma.done.wait [#allocation6], 512  }
  0x68   :  { %1186 = vsyncadd [#allocation6], 4294966784 }
  0x69   :  { %1187 = dma.done.wait [#allocation9], 3072  }
  0x6a   :  { %1188 = vsyncadd [#allocation9], 4294964224 }
  0x6b   :  { %1189 = dma.done.wait [#allocation12], 2048  }
  0x6c   :  { %1190 = vsyncadd [#allocation12], 4294965248  ;;  %v133_v0 = vld [vmem:[#allocation8] sm:$0xff]  ;;  %v134_v1 = vld [vmem:[#allocation8 + $0x8] sm:$0xff]  ;;  %vm141_vm0 = vcmask 523264   ;;  %v223_v52 = vlaneseq  ;;  %s1201_s27 = smov 64  }
  0x6d   :  { %v254_v2 = vld [vmem:[#allocation10] sm:$0xff]  ;;  %v931_v3 = vpack.c.bf16 %v134_v1, %v133_v0  ;;  %v255_v4 = vld [vmem:[#allocation10 + $0x8] sm:$0xff]  ;;  %v135_v5 = vld [vmem:[#allocation8 + $0x10] sm:$0xff]  ;;  %s1202_s12 = smov [#allocation13]  }
  0x6e   :  { %v136_v6 = vld [vmem:[#allocation8 + $0x18] sm:$0xff]  ;;  %v947_v7 = vpack.c.bf16 %v255_v4, %v254_v2  ;;  %v256_v9 = vld [vmem:[#allocation10 + $0x10] sm:$0xff]  ;;  %v137_v11 = vld [vmem:[#allocation8 + $0x20] sm:$0xff]  ;;  %v1376_v53 = vshrl.u32 %v223_v52, 7  ;;  %s755_s13 = sshll.u32 %s1202_s12, 4  ;;  %s756_s13 = int_to_ptr.vmem [resolvable:$true] %s755_s13 }
  0x6f   :  { %v935_v8 = vpack.c.bf16 %v136_v6, %v135_v5  ;;  %v257_v10 = vld [vmem:[#allocation10 + $0x18] sm:$0xff]  ;;  %932 = vmatprep.subr.bf16.mxu0 %v931_v3  ;;  %v138_v13 = vld [vmem:[#allocation8 + $0x28] sm:$0xff]  ;;  %v258_v14 = vld [vmem:[#allocation10 + $0x20] sm:$0xff]  ;;  %p1166_p7 = scmp.lt.s32.totalorder %s756_s13, %s756_s13 }
  0x70   :  { %v951_v12 = vpack.c.bf16 %v257_v10, %v256_v9  ;;  %v259_v15 = vld [vmem:[#allocation10 + $0x28] sm:$0xff]  ;;  %948 = vmatprep.subr.bf16.mxu1 %v947_v7  ;;  %934 = vmatpush3.bf16.msra.mxu0 %v931_v3  ;;  %v939_v16 = vpack.c.bf16 %v138_v13, %v137_v11  ;;  %v131_v17 = vld [vmem:[#allocation5] sm:$0xff]  ;;  %v1369_v18 = vld [vmem:[#allocation2] sm:$0xff]  ;;  %v225_v58 = vadd.s32 8, %v1376_v53  ;;  %v230_v62 = vand.u32 7, %v1376_v53 }
  0x71   :  { %950 = vmatpush3.bf16.msra.mxu1 %v947_v7  ;;  %936 = vmatprep.subr.bf16.mxu0 %v935_v8  ;;  %v955_v19 = vpack.c.bf16 %v259_v15, %v258_v14  ;;  %v139_v20 = vld [vmem:[#allocation8 + $0x30] sm:$0xff]  ;;  %v140_v21 = vld [vmem:[#allocation8 + $0x38] sm:$0xff]  ;;  %v132_v26 = vld [vmem:[#allocation5 + $0x8] sm:$0xff]  ;;  %vm358_vm3 = vcmp.lt.s32.totalorder %v1376_v53, 1  ;;  %vm365_vm4 = vcmp.lt.s32.totalorder %v1376_v53, 7 }
  0x72   :  { %952 = vmatprep.subr.bf16.mxu1 %v951_v12  ;;  %852 = vmatprep.mubr.msk.f32.mxu0 %vm141_vm0, %v131_v17  ;;  %v260_v22 = vld [vmem:[#allocation10 + $0x30] sm:$0xff]  ;;  %v261_v23 = vld [vmem:[#allocation10 + $0x38] sm:$0xff]  ;;  %v943_v24 = vpack.c.bf16 %v140_v21, %v139_v20  ;;  %v378_v28 = vld [vmem:[#allocation11] sm:$0xff]  ;;  %v237_v1 = vand.u32 7, %v225_v58  ;;  %vm1386_vm1 = vcmp.eq.s32.totalorder %v230_v62, 0  ;;  %vm1390_vm2 = vcmp.eq.s32.totalorder %v230_v62, 7 }
  0x73   :  { %871 = vmatprep.mubr.msk.f32.mxu1 %vm141_vm0, %v1369_v18  ;;  %v959_v25 = vpack.c.bf16 %v261_v23, %v260_v22  ;;  %v119_v27 = vld [vmem:[#allocation2 + $0x8] sm:$0xff]  ;;  %v379_v29 = vld [vmem:[#allocation11 + $0x8] sm:$0xff]  ;;  %v470_v31 = vld [vmem:[#allocation10 + $0x40] sm:$0xff] }
  0x74   :  { %938 = vmatpush3.bf16.msra.mxu0 %v935_v8  ;;  %v963_v30 = vpack.c.bf16 %v379_v29, %v378_v28  ;;  %v471_v32 = vld [vmem:[#allocation10 + $0x48] sm:$0xff]  ;;  %v380_v34 = vld [vmem:[#allocation11 + $0x10] sm:$0xff]  ;;  %v381_v35 = vld [vmem:[#allocation11 + $0x18] sm:$0xff]  ;;  %vm1396_vm5 = vcmp.eq.s32.totalorder %v237_v1, 0  ;;  %vm1400_vm6 = vcmp.eq.s32.totalorder %v237_v1, 7 }
  0x75   :  { %954 = vmatpush3.bf16.msra.mxu1 %v951_v12  ;;  %940 = vmatprep.subr.bf16.mxu0 %v939_v16  ;;  %v979_v33 = vpack.c.bf16 %v471_v32, %v470_v31  ;;  %v967_v36 = vpack.c.bf16 %v381_v35, %v380_v34  ;;  %v472_v37 = vld [vmem:[#allocation10 + $0x50] sm:$0xff]  ;;  %v473_v38 = vld [vmem:[#allocation10 + $0x58] sm:$0xff]  ;;  %v382_v39 = vld [vmem:[#allocation11 + $0x20] sm:$0xff] }
  0x76   :  { %956 = vmatprep.subr.bf16.mxu1 %v955_v19  ;;  %v983_v40 = vpack.c.bf16 %v473_v38, %v472_v37  ;;  %v383_v41 = vld [vmem:[#allocation11 + $0x28] sm:$0xff]  ;;  %v474_v42 = vld [vmem:[#allocation10 + $0x60] sm:$0xff]  ;;  %v384_v46 = vld [vmem:[#allocation11 + $0x30] sm:$0xff] }
  0x77   :  { %v475_v43 = vld [vmem:[#allocation10 + $0x68] sm:$0xff]  ;;  %v971_v44 = vpack.c.bf16 %v383_v41, %v382_v39  ;;  %v385_v47 = vld [vmem:[#allocation11 + $0x38] sm:$0xff]  ;;  %v476_v48 = vld [vmem:[#allocation10 + $0x70] sm:$0xff] }
  0x78   :  { %942 = vmatpush3.bf16.msra.mxu0 %v939_v16  ;;  %v987_v45 = vpack.c.bf16 %v475_v43, %v474_v42  ;;  %v975_v49 = vpack.c.bf16 %v385_v47, %v384_v46  ;;  %v477_v50 = vld [vmem:[#allocation10 + $0x78] sm:$0xff]  ;;  %v775_v56 = vld [vmem:[%s1482_s5] ss:$0 sm:$0xff]  ;;  %v602_v28 = vld [vmem:[#allocation11 + $0x40] sm:$0xff] }
  0x79   :  { %958 = vmatpush3.bf16.msra.mxu1 %v955_v19  ;;  %944 = vmatprep.subr.bf16.mxu0 %v943_v24  ;;  %v991_v51 = vpack.c.bf16 %v477_v50, %v476_v48  ;;  %v603_v29 = vld [vmem:[#allocation11 + $0x48] sm:$0xff]  ;;  %v604_v31 = vld [vmem:[#allocation11 + $0x50] sm:$0xff]  ;;  %v605_v32 = vld [vmem:[#allocation11 + $0x58] sm:$0xff] }
  0x7a   :  { %960 = vmatprep.subr.bf16.mxu1 %v959_v25  ;;  %v606_v34 = vld [vmem:[#allocation11 + $0x60] sm:$0xff]  ;;  %v607_v35 = vld [vmem:[#allocation11 + $0x68] sm:$0xff]  ;;  %v609_v38 = vld [vmem:[#allocation11 + $0x78] sm:$0xff] }
  0x7b   :  { %v1003_v37 = vpack.c.bf16 %v607_v35, %v606_v34  ;;  %v781_v42 = vld [vmem:[%s1482_s5 + $0x1] ss:$0 sm:$0xff] }
  0x7c   :  { %946 = vmatpush3.bf16.msra.mxu0 %v943_v24 }
  0x7d   :  { %962 = vmatpush3.bf16.msra.mxu1 %v959_v25  ;;  %964 = vmatprep.subr.bf16.mxu0 %v963_v30 }
  0x7e   :  { %980 = vmatprep.subr.bf16.mxu1 %v979_v33 }
  0x7f   :  { %853 = vmatmul.mubr.msk.f32.vlgmr.msra.gmra.mrb[0].mxu0 %vm141_vm0, %v132_v26 }
  0x80   :  { %872 = vmatmul.mubr.msk.f32.vlgmr.msra.gmra.mrb[0].mxu1 %vm141_vm0, %v119_v27  ;;  %966 = vmatpush3.bf16.msra.mxu0 %v963_v30  ;;  %v995_v30 = vpack.c.bf16 %v603_v29, %v602_v28 }
  0x81   :  { %982 = vmatpush3.bf16.msra.mxu1 %v979_v33  ;;  %968 = vmatprep.subr.bf16.mxu0 %v967_v36  ;;  %v999_v33 = vpack.c.bf16 %v605_v32, %v604_v31 }
  0x82   :  { %984 = vmatprep.subr.bf16.mxu1 %v983_v40 }
  0x84   :  { %970 = vmatpush3.bf16.msra.mxu0 %v967_v36  ;;  %v608_v36 = vld [vmem:[#allocation11 + $0x70] sm:$0xff] }
  0x85   :  { %986 = vmatpush3.bf16.msra.mxu1 %v983_v40  ;;  %972 = vmatprep.subr.bf16.mxu0 %v971_v44  ;;  %v1007_v39 = vpack.c.bf16 %v609_v38, %v608_v36 }
  0x86   :  { %988 = vmatprep.subr.bf16.mxu1 %v987_v45 }
  0x88   :  { %974 = vmatpush3.bf16.msra.mxu0 %v971_v44 }
  0x89   :  { %976 = vmatprep.subr.bf16.mxu0 %v975_v49  ;;  %990 = vmatpush3.bf16.msra.mxu1 %v987_v45 }
  0x8a   :  { %992 = vmatprep.subr.bf16.mxu1 %v991_v51 }
  0x8c   :  { %978 = vmatpush3.bf16.msra.mxu0 %v975_v49 }
  0x8d   :  { %994 = vmatpush3.bf16.msra.mxu1 %v991_v51  ;;  %996 = vmatprep.subr.bf16.mxu0 %v995_v30 }
 0x152   :  { %v854_v54 = vpop.f32.mrb[0].mxu0 }
 0x153   :  { %v873_v55 = vpop.f32.mrb[0].mxu1  ;;  %v214_v57 = vpop.f32.mrb[1].mxu0 }
 0x154   :  { %v344_v59 = vadd.f32 %v873_v55, %v119_v27  ;;  %v334_v60 = vpop.f32.mrb[1].mxu1  ;;  %573 = vrot.lane.b32.xlu0 %v214_v57, %s1201_s27 }
 0x155   :  { %v343_v61 = vadd.f32 %v334_v60, %v1369_v18 }
 0x156   :  { %v353_v63 = vadd.f32 %v775_v56, %v344_v59 }
 0x157   :  { %v352_v0 = vadd.f32 %v775_v56, %v343_v61 }
 0x158   :  { %v355_v2 = vadd.f32 %v854_v54, %v353_v63  ;;  %575 = vrot.lane.b32.xlu0 %v854_v54, %s1201_s27 }
 0x159   :  { %v354_v3 = vadd.f32 %v352_v0, %v214_v57 }
 0x15a   :  { %v357_v6 = vrot.slane %v355_v2, 7  ;;  %v364_v7 = vrot.slane %v355_v2, 1 }
 0x15b   :  { %v356_v8 = vrot.slane %v354_v3, 7  ;;  %v363_v9 = vrot.slane %v354_v3, 1 }
 0x15d   :  { %v360_v12 = vsel %vm358_vm3, %v357_v6, %v356_v8  ;;  %v366_v13 = vsel %vm365_vm4, %v363_v9, %v364_v7  ;;  %v359_v14 = vsel %vm358_vm3, %v356_v8, %v357_v6  ;;  %v367_v15 = vsel %vm365_vm4, %v364_v7, %v363_v9 }
 0x15e   :  { %v361_v16 = vsel %vm1386_vm1, %v354_v3, %v360_v12  ;;  %v368_v17 = vsel %vm1390_vm2, %v354_v3, %v366_v13  ;;  %v362_v18 = vsel %vm1396_vm5, %v355_v2, %v359_v14  ;;  %v369_v19 = vsel %vm1400_vm6, %v355_v2, %v367_v15 }
 0x15f   :  { %v370_v20 = vadd.f32 %v361_v16, %v354_v3  ;;  %v371_v21 = vadd.f32 %v362_v18, %v355_v2 }
 0x161   :  { %v372_v22 = vadd.f32 %v370_v20, %v368_v17  ;;  %v373_v23 = vadd.f32 %v371_v21, %v369_v19  ;;  %v770_v19 = vld [vmem:[%s1484_s7] ss:$0 sm:$0xff] }
 0x162   :  { %v120_v20 = vld [vmem:[#allocation7] sm:$0xff] }
 0x163   :  { %v374_v24 = vmul.f32 0.33333334, %v372_v22  ;;  %v375_v25 = vmul.f32 0.33333334, %v373_v23  ;;  %v129_v21 = vadd.f32 %v770_v19, %v120_v20  ;;  %v121_v22 = vld [vmem:[#allocation7 + $0x8] sm:$0xff] }
 0x165   :  { %890 = vmatprep.mubr.msk.f32.mxu0 %vm141_vm0, %v374_v24  ;;  %v376_v26 = vsub.f32 %v354_v3, %v374_v24  ;;  %v377_v27 = vsub.f32 %v355_v2, %v375_v25 }
 0x166   :  { %891 = vmatmul.mubr.msk.f32.vlgmr.msra.gmra.mrb[2].mxu0 %vm141_vm0, %v375_v25  ;;  %v130_v25 = vadd.f32 %v770_v19, %v121_v22 }
 0x167   :  { %909 = vmatprep.mubr.msk.f32.mxu1 %vm141_vm0, %v376_v26  ;;  %998 = vmatpush3.bf16.msra.mxu0 %v995_v30 }
 0x168   :  { %910 = vmatmul.mubr.msk.f32.vlgmr.msra.gmra.mrb[2].mxu1 %vm141_vm0, %v377_v27  ;;  %1000 = vmatprep.subr.bf16.mxu0 %v999_v33 }
 0x16b   :  { %1002 = vmatpush3.bf16.msra.mxu0 %v999_v33 }
 0x16c   :  { %1004 = vmatprep.subr.bf16.mxu0 %v1003_v37 }
 0x16f   :  { %1006 = vmatpush3.bf16.msra.mxu0 %v1003_v37  ;;  %v784_v37 = vld [vmem:[%s1485_s8] ss:$0 sm:$0xff]  ;;  %s1161_s8 = scalar_lea.vmem %s756_s13, 256 }
 0x170   :  { %1008 = vmatprep.subr.bf16.mxu0 %v1007_v39  ;;  %p1162_p6 = scmp.ne.s32.totalorder %s756_s13, %s1161_s8  ;;  %p1167_p8 = scmp.lt.s32.totalorder %s1161_s8, %s1161_s8 }
 0x172   :  { %p1168_p9 = por %p1167_p8, %p1166_p7 }
 0x173   :  { %1010 = vmatpush3.bf16.msra.mxu0 %v1007_v39 }
 0x174   :  { %p1169_p10 = pnand %p1168_p9, %p1162_p6 }
 0x1c6   :  { %v574_v40 = vpop.permute.xlu0 %573 }
 0x1ca   :  { %v576_v47 = vpop.permute.xlu0 %575 }
 0x23b   :  { %v911_v41 = vpop.f32.mrb[2].mxu1 }
 0x23c   :  { %v560_v43 = vadd.f32 %v911_v41, %v377_v27  ;;  %v550_v44 = vpop.f32.mrb[3].mxu1 }
 0x23d   :  { %v559_v45 = vadd.f32 %v550_v44, %v376_v26 }
 0x23e   :  { %v570_v46 = vadd.f32 %v781_v42, %v560_v43 }
 0x23f   :  { %v569_v48 = vadd.f32 %v781_v42, %v559_v45 }
 0x240   :  { %v580_v49 = vadd.f32 %v576_v47, %v570_v46 }
 0x241   :  { %v579_v50 = vadd.f32 %v574_v40, %v569_v48  ;;  %v785_v40 = vld [vmem:[%s1486_s9] ss:$0 sm:$0xff] }
 0x242   :  { %v582_v51 = vrot.slane %v580_v49, 7  ;;  %v588_v52 = vrot.slane %v580_v49, 1 }
 0x243   :  { %v581_v54 = vrot.slane %v579_v50, 7  ;;  %v587_v55 = vrot.slane %v579_v50, 1 }
 0x245   :  { %v584_v56 = vsel %vm358_vm3, %v582_v51, %v581_v54  ;;  %v589_v57 = vsel %vm365_vm4, %v587_v55, %v588_v52  ;;  %v583_v58 = vsel %vm358_vm3, %v581_v54, %v582_v51  ;;  %v590_v59 = vsel %vm365_vm4, %v588_v52, %v587_v55 }
 0x246   :  { %v585_v60 = vsel %vm1386_vm1, %v579_v50, %v584_v56  ;;  %v591_v61 = vsel %vm1390_vm2, %v579_v50, %v589_v57  ;;  %v586_v62 = vsel %vm1396_vm5, %v580_v49, %v583_v58  ;;  %v592_v63 = vsel %vm1400_vm6, %v580_v49, %v590_v59 }
 0x247   :  { %v593_v0 = vadd.f32 %v585_v60, %v579_v50  ;;  %v594_v1 = vadd.f32 %v586_v62, %v580_v49 }
 0x249   :  { %v595_v2 = vadd.f32 %v593_v0, %v591_v61  ;;  %v596_v3 = vadd.f32 %v594_v1, %v592_v63 }
 0x24b   :  { %v597_v6 = vmul.f32 0.33333334, %v595_v2  ;;  %v598_v7 = vmul.f32 0.33333334, %v596_v3 }
 0x24d   :  { %928 = vmatprep.mubr.msk.f32.mxu0 %vm141_vm0, %v597_v6  ;;  %v599_v53 = vsub.f32 %v579_v50, %v597_v6  ;;  %v600_v4 = vsub.f32 %v580_v49, %v598_v7 }
 0x24e   :  { %929 = vmatmul.mubr.msk.f32.vlgmr.msra.gmra.mrb[2].mxu0 %vm141_vm0, %v598_v7 }
 0x24f   :  { %v693_v5 = vsel %vm141_vm0, %v599_v53, 0.0  ;;  %v696_v8 = vsel %vm141_vm0, %v600_v4, 0.0 }
 0x250   :  { %694 = vadd.xlane.f32.xlu1 %v693_v5 }
 0x254   :  { %697 = vadd.xlane.f32.xlu1 %v696_v8 }
 0x2dd   :  { %v695_v9 = vpop.xlane.xlu1 %694 }
 0x2de   :  { %v700_v10 = vmul.f32 0.015625, %v695_v9 }
 0x2e0   :  { %v702_v11 = vsub.f32 %v599_v53, %v700_v10 }
 0x2e1   :  { %v698_v12 = vpop.xlane.xlu1 %697 }
 0x2e2   :  { %v701_v13 = vmul.f32 0.015625, %v698_v12  ;;  %v704_v14 = vmul.f32 %v702_v11, %v702_v11 }
 0x2e4   :  { %v703_v15 = vsub.f32 %v600_v4, %v701_v13  ;;  %v706_v16 = vsel %vm141_vm0, %v704_v14, 0.0 }
 0x2e5   :  { %707 = vadd.xlane.f32.xlu0 %v706_v16 }
 0x2e6   :  { %v705_v17 = vmul.f32 %v703_v15, %v703_v15 }
 0x2e8   :  { %v709_v18 = vsel %vm141_vm0, %v705_v17, 0.0 }
 0x2e9   :  { %710 = vadd.xlane.f32.xlu1 %v709_v18 }
 0x321   :  { %v930_v23 = vpop.f32.mrb[2].mxu0 }
 0x322   :  { %v682_v24 = vpop.f32.mrb[3].mxu0  ;;  %v1011_v27 = vadd.f32 %v930_v23, %v130_v25 }
 0x323   :  { %v1012_v26 = vadd.f32 %v682_v24, %v129_v21 }
 0x325   :  { %740 = vrot.lane.b32.xlu1 %v1012_v26, %s1201_s27 }
 0x329   :  { %742 = vrot.lane.b32.xlu1 %v1011_v27, %s1201_s27 }
 0x372   :  { %v708_v28 = vpop.xlane.xlu0 %707 }
 0x373   :  { %v712_v29 = vmul.f32 0.015625, %v708_v28 }
 0x375   :  { %v714_v31 = vadd.f32 1e-05, %v712_v29 }
 0x376   :  { %v711_v30 = vpop.xlane.xlu1 %710 }
 0x377   :  { %v713_v32 = vmul.f32 0.015625, %v711_v30  ;;  %1025 = vrsqrt.f32 %v714_v31 }
 0x379   :  { %v715_v33 = vadd.f32 1e-05, %v713_v32 }
 0x37b   :  { %1027 = vrsqrt.f32 %v715_v33 }
 0x381   :  { %v1026_v34 = vpop.eup %1025 }
 0x382   :  { %v718_v35 = vmul.f32 %v1026_v34, %v702_v11 }
 0x384   :  { %v727_v38 = vmul.f32 %v784_v37, %v718_v35 }
 0x385   :  { %v1028_v36 = vpop.eup %1027 }
 0x386   :  { %v719_v39 = vmul.f32 %v1028_v36, %v703_v15  ;;  %v736_v41 = vadd.f32 %v785_v40, %v727_v38 }
 0x388   :  { %v728_v42 = vmul.f32 %v784_v37, %v719_v39 }
 0x38a   :  { %v737_v45 = vadd.f32 %v785_v40, %v728_v42 }
 0x397   :  { %v741_v43 = vpop.permute.xlu1 %740 }
 0x398   :  { %v746_v44 = vsel %vm141_vm0, %v736_v41, %v741_v43 }
 0x399   :  { %748 = vst [vmem:[#allocation13] sm:$0xff] %v746_v44 }
 0x39b   :  { %v743_v46 = vpop.permute.xlu1 %742 }
 0x39c   :  { %v747_v47 = vsel %vm141_vm0, %v737_v45, %v743_v46 }
 0x39d   :  { %749 = vst [vmem:[#allocation13 + $0x8] sm:$0xff] %v747_v47 }
 0x39e   :  { %1172 = shalt.err (!%p1169_p10)
}
 0x39f   :  { %s1173_s22 = scalar_lea.hbm %s1487_s10, 256 }
 0x3a0   :  { %p1174_p11 = scmp.ne.s32.totalorder %s1487_s10, %s1173_s22  ;;  %p1177_p12 = scmp.lt.u32.totalorder %s1173_s22, %s1487_s10 }
 0x3a2   :  { %p1179_p13 = pnand %p1177_p12, %p1174_p11 }
 0x3a4   :  { %1182 = shalt.err (!%p1179_p13)
}
 0x3a5   :  { %761 = dma.vmem_to_hbm [thread:$0]  %s756_s13, 256, %s1487_s10, [#allocation4], %s1195_s25, %s1195_s25, %s1196_s26  }
 0x3a6   :  { %1191 = dma.done.wait [#allocation4], 256  }
 0x3a7   :  { %1192 = vsyncadd [#allocation4], 4294967040 }
 0x3a8   :  { %765 = vsyncpa [#allocation3], 1 }
 0x3a9   :  { %766 = vsyncpa [#allocation6], 1 }
 0x3aa   :  { %767 = vsyncpa [#allocation9], 1 }
 0x3ab   :  { %768 = vsyncpa [#allocation12], 1 }
 0x3ac   :  { %769 = vsyncpa [#allocation4], 1 }

</bundles_post_ra>
